<compile_context>
chip_gen: v7x
topology: tpu7x:2x2x1
jax: 0.10.0
libtpu: 0.0.40
codegen_flags: <defaults>
</compile_context>

<pallas_src>
import functools

import jax
import jax.numpy as jnp
from jax.experimental import pallas as pl
from jax.experimental.pallas import tpu as pltpu

IN_DIM = 28 * 28          # 784  (divisible by 8; full-dim block, no HBM padding)
HIDDEN_1 = 100
HIDDEN_2 = 100
OUT_DIM = 10

# Lane-dense padded dims for the VMEM-resident weights (multiples of 128).
H1_PAD = 128
H2_PAD = 128
OUT_PAD = 128


def _round_up(x, m):
    return ((x + m - 1) // m) * m


def _mlp_kernel(x_ref, w1_ref, b1_ref, w2_ref, b2_ref, w3_ref, b3_ref, o_ref):
    # x arrives as f32 straight from HBM (single read); cast to bf16 for the MXU here.
    x = x_ref[...].astype(jnp.bfloat16)

    h1 = jnp.dot(x, w1_ref[...], preferred_element_type=jnp.float32) + b1_ref[...]
    h1 = jnp.maximum(h1, 0.0).astype(jnp.bfloat16)

    h2 = jnp.dot(h1, w2_ref[...], preferred_element_type=jnp.float32) + b2_ref[...]
    h2 = jnp.maximum(h2, 0.0).astype(jnp.bfloat16)

    out = jnp.dot(h2, w3_ref[...], preferred_element_type=jnp.float32) + b3_ref[...]
    # Keep the matmul lane-aligned (N=128), store only the 10 real logit columns.
    o_ref[...] = out[:, :OUT_DIM].astype(o_ref.dtype)


@functools.partial(jax.jit, static_argnames=("block_b",))
def very_simple_net(img, params, block_b=1024):
    """Forward pass of VerySimpleNet.

    img: (B, 1, 28, 28) float32 (NCHW, like PyTorch).
    params: dict with w1 (784,100), b1 (100,), w2 (100,100), b2 (100,),
            w3 (100,10), b3 (10,) -- weights stored as (in, out) so the kernel
            computes x @ W + b (== torch's x @ W_pt.T + b).
    returns: (B, 10) float32 logits.
    """
    b = img.shape[0]
    x = img.reshape(b, IN_DIM)  # same semantics as torch .view(-1, 784); free reshape

    # ---- batch tiling --------------------------------------------------------
    # Large tiles for HBM-roofline efficiency; below 2*block_b split into ~2 tiles
    # so v7x's two TensorCores are both used (v5e/v6e are single-TC: harmless).
    b8 = _round_up(b, 8)
    if b8 >= 2 * block_b:
        bb = block_b
    else:
        bb = min(block_b, max(8, _round_up((b8 + 1) // 2, 8)))
    b_pad = _round_up(b8, bb)
    grid = (b_pad // bb,)

    if b_pad != b:
        x = jnp.pad(x, ((0, b_pad - b), (0, 0)))  # zero rows, sliced off at the end

    # ---- small, VMEM-resident weights: pad to lane-dense 128 + cast to bf16 ----
    w1 = jnp.pad(params["w1"], ((0, 0), (0, H1_PAD - HIDDEN_1))).astype(jnp.bfloat16)
    w2 = jnp.pad(params["w2"], ((0, H1_PAD - HIDDEN_1), (0, H2_PAD - HIDDEN_2))).astype(jnp.bfloat16)
    w3 = jnp.pad(params["w3"], ((0, H2_PAD - HIDDEN_2), (0, OUT_PAD - OUT_DIM))).astype(jnp.bfloat16)

    b1 = jnp.pad(params["b1"], (0, H1_PAD - HIDDEN_1)).reshape(1, H1_PAD)
    b2 = jnp.pad(params["b2"], (0, H2_PAD - HIDDEN_2)).reshape(1, H2_PAD)
    b3 = jnp.pad(params["b3"], (0, OUT_PAD - OUT_DIM)).reshape(1, OUT_PAD)

    out = pl.pallas_call(
        _mlp_kernel,
        out_shape=jax.ShapeDtypeStruct((b_pad, OUT_DIM), jnp.float32),
        grid_spec=pl.GridSpec(
            grid=grid,
            in_specs=[
                pl.BlockSpec((bb, IN_DIM), lambda i: (i, 0)),        # x tile (streamed, f32)
                pl.BlockSpec((IN_DIM, H1_PAD), lambda i: (0, 0)),    # w1 (resident)
                pl.BlockSpec((1, H1_PAD), lambda i: (0, 0)),         # b1
                pl.BlockSpec((H1_PAD, H2_PAD), lambda i: (0, 0)),    # w2
                pl.BlockSpec((1, H2_PAD), lambda i: (0, 0)),         # b2
                pl.BlockSpec((H2_PAD, OUT_PAD), lambda i: (0, 0)),   # w3
                pl.BlockSpec((1, OUT_PAD), lambda i: (0, 0)),        # b3
            ],
            out_specs=pl.BlockSpec((bb, OUT_DIM), lambda i: (i, 0)), # narrow f32 logits
        ),
        compiler_params=pltpu.CompilerParams(
            dimension_semantics=("parallel",),
            vmem_limit_bytes=48 * 1024 * 1024,
        ),
    )(x, w1, b1, w2, b2, w3, b3)

    # Strip batch padding; output columns are already exactly 10.
    return out[:b, :]


def init_params(key):
    """Deterministic init matching nn.Linear defaults (uniform +/- 1/sqrt(fan_in)).

    Weights are stored transposed, i.e. shape (in, out)."""
    ks = jax.random.split(key, 6)

    def linear(kw, kb, fan_in, fan_out):
        bound = 1.0 / jnp.sqrt(fan_in)
        w = jax.random.uniform(kw, (fan_in, fan_out), jnp.float32, -bound, bound)
        b = jax.random.uniform(kb, (fan_out,), jnp.float32, -bound, bound)
        return w, b

    w1, b1 = linear(ks[0], ks[1], IN_DIM, HIDDEN_1)
    w2, b2 = linear(ks[2], ks[3], HIDDEN_1, HIDDEN_2)
    w3, b3 = linear(ks[4], ks[5], HIDDEN_2, OUT_DIM)
    return {"w1": w1, "b1": b1, "w2": w2, "b2": b2, "w3": w3, "b3": b3}


def _reference(img, params):
    x = img.reshape(img.shape[0], IN_DIM)
    h1 = jnp.maximum(x @ params["w1"] + params["b1"], 0.0)
    h2 = jnp.maximum(h1 @ params["w2"] + params["b2"], 0.0)
    return h2 @ params["w3"] + params["b3"]


if __name__ == "__main__":
    key = jax.random.PRNGKey(0)
    k_img, k_params = jax.random.split(key)

    batch = 8
    img = jax.random.normal(k_img, (batch, 1, 28, 28), dtype=jnp.float32)
    params = init_params(k_params)

    out = very_simple_net(img, params)
    out = jax.block_until_ready(out)

    ref = _reference(img, params)
    assert out.shape == (batch, OUT_DIM)
    # bf16 MXU inputs (x cast in-kernel, bf16 weights) with f32 accumulation ->
    # relaxed tolerance vs the f32 reference.
    assert jnp.allclose(out, ref, atol=5e-2, rtol=5e-2), "mismatch vs JAX reference"

    print("KERNEL_OK")
</pallas_src>

<mosaic_0001>
module attributes {stable_mosaic.version = 11 : i64} {
  func.func @_mlp_kernel(%arg0: i32, %arg1: memref<8x784xf32, #tpu.memory_space<vmem>>, %arg2: memref<784x128xbf16, #tpu.memory_space<vmem>>, %arg3: memref<1x128xf32, #tpu.memory_space<vmem>>, %arg4: memref<128x128xbf16, #tpu.memory_space<vmem>>, %arg5: memref<1x128xf32, #tpu.memory_space<vmem>>, %arg6: memref<128x128xbf16, #tpu.memory_space<vmem>>, %arg7: memref<1x128xf32, #tpu.memory_space<vmem>>, %arg8: memref<8x10xf32, #tpu.memory_space<vmem>>) attributes {dimension_semantics = [#tpu.dimension_semantics<parallel>], iteration_bounds = array<i64: 1>, scalar_prefetch = 0 : i64, scratch_operands = 0 : i64, tpu.core_type = #tpu.core_type<tc>, window_params = [{transform_indices = @transform_0, window_bounds = array<i64: 8, 784>}, {pipeline_mode = #tpu.pipeline_mode<synchronous>, transform_indices = @transform_1, window_bounds = array<i64: 784, 128>}, {pipeline_mode = #tpu.pipeline_mode<synchronous>, transform_indices = @transform_2, window_bounds = array<i64: 1, 128>}, {pipeline_mode = #tpu.pipeline_mode<synchronous>, transform_indices = @transform_3, window_bounds = array<i64: 128, 128>}, {pipeline_mode = #tpu.pipeline_mode<synchronous>, transform_indices = @transform_4, window_bounds = array<i64: 1, 128>}, {pipeline_mode = #tpu.pipeline_mode<synchronous>, transform_indices = @transform_5, window_bounds = array<i64: 128, 128>}, {pipeline_mode = #tpu.pipeline_mode<synchronous>, transform_indices = @transform_6, window_bounds = array<i64: 1, 128>}, {transform_indices = @transform_7, window_bounds = array<i64: 8, 10>}]} {
    %c0 = arith.constant 0 : index
    %c0_0 = arith.constant 0 : index
    %0 = vector.load %arg1[%c0, %c0_0] : memref<8x784xf32, #tpu.memory_space<vmem>>, vector<8x784xf32>
    %1 = arith.truncf %0 : vector<8x784xf32> to vector<8x784xbf16>
    %c0_1 = arith.constant 0 : index
    %c0_2 = arith.constant 0 : index
    %2 = vector.load %arg2[%c0_1, %c0_2] : memref<784x128xbf16, #tpu.memory_space<vmem>>, vector<784x128xbf16>
    %cst = arith.constant dense<0.000000e+00> : vector<8x128xf32>
    %3 = tpu.matmul %1, %2, %cst {dimension_numbers = #tpu.dot_dimension_numbers<[1], [0], [0], [1], [0, 0, 1, 1], [], []>} : vector<8x784xbf16>, vector<784x128xbf16>, vector<8x128xf32> -> vector<8x128xf32>
    %c0_3 = arith.constant 0 : index
    %c0_4 = arith.constant 0 : index
    %4 = vector.load %arg3[%c0_3, %c0_4] : memref<1x128xf32, #tpu.memory_space<vmem>>, vector<1x128xf32>
    %5 = vector.broadcast %4 : vector<1x128xf32> to vector<8x128xf32>
    %6 = arith.addf %3, %5 : vector<8x128xf32>
    %cst_5 = arith.constant 0.000000e+00 : f32
    %7 = vector.broadcast %cst_5 : f32 to vector<8x128xf32>
    %8 = arith.maximumf %6, %7 : vector<8x128xf32>
    %9 = arith.truncf %8 : vector<8x128xf32> to vector<8x128xbf16>
    %c0_6 = arith.constant 0 : index
    %c0_7 = arith.constant 0 : index
    %10 = vector.load %arg4[%c0_6, %c0_7] : memref<128x128xbf16, #tpu.memory_space<vmem>>, vector<128x128xbf16>
    %cst_8 = arith.constant dense<0.000000e+00> : vector<8x128xf32>
    %11 = tpu.matmul %9, %10, %cst_8 {dimension_numbers = #tpu.dot_dimension_numbers<[1], [0], [0], [1], [0, 0, 1, 1], [], []>} : vector<8x128xbf16>, vector<128x128xbf16>, vector<8x128xf32> -> vector<8x128xf32>
    %c0_9 = arith.constant 0 : index
    %c0_10 = arith.constant 0 : index
    %12 = vector.load %arg5[%c0_9, %c0_10] : memref<1x128xf32, #tpu.memory_space<vmem>>, vector<1x128xf32>
    %13 = vector.broadcast %12 : vector<1x128xf32> to vector<8x128xf32>
    %14 = arith.addf %11, %13 : vector<8x128xf32>
    %cst_11 = arith.constant 0.000000e+00 : f32
    %15 = vector.broadcast %cst_11 : f32 to vector<8x128xf32>
    %16 = arith.maximumf %14, %15 : vector<8x128xf32>
    %17 = arith.truncf %16 : vector<8x128xf32> to vector<8x128xbf16>
    %c0_12 = arith.constant 0 : index
    %c0_13 = arith.constant 0 : index
    %18 = vector.load %arg6[%c0_12, %c0_13] : memref<128x128xbf16, #tpu.memory_space<vmem>>, vector<128x128xbf16>
    %cst_14 = arith.constant dense<0.000000e+00> : vector<8x128xf32>
    %19 = tpu.matmul %17, %18, %cst_14 {dimension_numbers = #tpu.dot_dimension_numbers<[1], [0], [0], [1], [0, 0, 1, 1], [], []>} : vector<8x128xbf16>, vector<128x128xbf16>, vector<8x128xf32> -> vector<8x128xf32>
    %c0_15 = arith.constant 0 : index
    %c0_16 = arith.constant 0 : index
    %20 = vector.load %arg7[%c0_15, %c0_16] : memref<1x128xf32, #tpu.memory_space<vmem>>, vector<1x128xf32>
    %21 = vector.broadcast %20 : vector<1x128xf32> to vector<8x128xf32>
    %22 = arith.addf %19, %21 : vector<8x128xf32>
    %23 = vector.extract_strided_slice %22 {offsets = [0, 0], sizes = [8, 10], strides = [1, 1]} : vector<8x128xf32> to vector<8x10xf32>
    %c0_17 = arith.constant 0 : index
    %c0_18 = arith.constant 0 : index
    %24 = vector.load %arg8[%c0_17, %c0_18] : memref<8x10xf32, #tpu.memory_space<vmem>>, vector<8x10xf32>
    tpu.vector_store %arg8[%c0_17, %c0_18], %23 {strides = array<i32>} : memref<8x10xf32, #tpu.memory_space<vmem>>, vector<8x10xf32>,
    return
  }
  func.func @transform_0(%arg0: i32) -> (i32, i32) {
    %c0_i32 = arith.constant 0 : i32
    %c0_i32_0 = arith.constant 0 : i32
    return %arg0, %c0_i32 : i32, i32
  }
  func.func @transform_1(%arg0: i32) -> (i32, i32) {
    %c0_i32 = arith.constant 0 : i32
    %c0_i32_0 = arith.constant 0 : i32
    %c0_i32_1 = arith.constant 0 : i32
    return %c0_i32, %c0_i32_0 : i32, i32
  }
  func.func @transform_2(%arg0: i32) -> (i32, i32) {
    %c0_i32 = arith.constant 0 : i32
    %c0_i32_0 = arith.constant 0 : i32
    %c0_i32_1 = arith.constant 0 : i32
    return %c0_i32, %c0_i32_0 : i32, i32
  }
  func.func @transform_3(%arg0: i32) -> (i32, i32) {
    %c0_i32 = arith.constant 0 : i32
    %c0_i32_0 = arith.constant 0 : i32
    %c0_i32_1 = arith.constant 0 : i32
    return %c0_i32, %c0_i32_0 : i32, i32
  }
  func.func @transform_4(%arg0: i32) -> (i32, i32) {
    %c0_i32 = arith.constant 0 : i32
    %c0_i32_0 = arith.constant 0 : i32
    %c0_i32_1 = arith.constant 0 : i32
    return %c0_i32, %c0_i32_0 : i32, i32
  }
  func.func @transform_5(%arg0: i32) -> (i32, i32) {
    %c0_i32 = arith.constant 0 : i32
    %c0_i32_0 = arith.constant 0 : i32
    %c0_i32_1 = arith.constant 0 : i32
    return %c0_i32, %c0_i32_0 : i32, i32
  }
  func.func @transform_6(%arg0: i32) -> (i32, i32) {
    %c0_i32 = arith.constant 0 : i32
    %c0_i32_0 = arith.constant 0 : i32
    %c0_i32_1 = arith.constant 0 : i32
    return %c0_i32, %c0_i32_0 : i32, i32
  }
  func.func @transform_7(%arg0: i32) -> (i32, i32) {
    %c0_i32 = arith.constant 0 : i32
    %c0_i32_0 = arith.constant 0 : i32
    return %arg0, %c0_i32 : i32, i32
  }
}

</mosaic_0001>

<bundles_post_ra>
// kernel: very_simple_net.1
= control target key start
LH: loop header
LB: loop body
LE: loop exit
PB: predicated region body
PF: predicated region fallthrough
CT: control target
= control target key end

     0   :  { %v1140_v44 = vmov 0.0   ;;  %vm1141_vm0 = vmmov 0   ;;  %vm441_vm1 = vcmask 130048   ;;  %s1443_s0 = inlined_call_operand.vmem [shape: f32[8,784], index: 0, kind: input, shape index: {}]   ;;  %s1444_s1 = inlined_call_operand.vmem [shape: bf16[784,128], index: 1, kind: input, shape index: {}]   ;;  %s1445_s2 = inlined_call_operand.vmem [shape: f32[1,128], index: 2, kind: input, shape index: {}]   ;;  %s1446_s3 = inlined_call_operand.vmem [shape: bf16[128,128], index: 3, kind: input, shape index: {}]   ;;  %s1447_s4 = inlined_call_operand.vmem [shape: f32[1,128], index: 4, kind: input, shape index: {}]   ;;  %s1448_s5 = inlined_call_operand.vmem [shape: bf16[128,128], index: 5, kind: input, shape index: {}]   ;;  %s1449_s6 = inlined_call_operand.vmem [shape: f32[1,128], index: 6, kind: input, shape index: {}]   ;;  %s1450_s7 = inlined_call_operand.hbm [shape: f32[8,10], index: 7, kind: output, shape index: {}]  }
   0x1   :  { %v1051_v0 = vld [vmem:[%s1444_s1 + $0x40] sm:$0xff]   ;;  %v1055_v4 = vld [vmem:[%s1444_s1 + $0x48] sm:$0xff]   ;;  %v1059_v8 = vld [vmem:[%s1444_s1 + $0x50] sm:$0xff]  }
   0x2   :  { %v1052_v1 = vld [vmem:[%s1444_s1] sm:$0xff]   ;;  %916 = vmatprep.subr.bf16.mxu0 %v1051_v0  ;;  %v1056_v5 = vld [vmem:[%s1444_s1 + $0x8] sm:$0xff]   ;;  %v1060_v9 = vld [vmem:[%s1444_s1 + $0x10] sm:$0xff]  }
   0x3   :  { %v1053_v2 = vld [vmem:[%s1444_s1 + $0xc0] sm:$0xff]   ;;  %917 = vmatpush3.bf16.msra.mxu0 %v1052_v1  ;;  %v1057_v6 = vld [vmem:[%s1444_s1 + $0xc8] sm:$0xff]   ;;  %v1061_v10 = vld [vmem:[%s1444_s1 + $0xd0] sm:$0xff]  }
   0x4   :  { %v1054_v3 = vld [vmem:[%s1444_s1 + $0x80] sm:$0xff]   ;;  %938 = vmatprep.subr.bf16.mxu1 %v1053_v2  ;;  %918 = vmatprep.subr.bf16.mxu0 %v1055_v4  ;;  %v1058_v7 = vld [vmem:[%s1444_s1 + $0x88] sm:$0xff]   ;;  %v1062_v11 = vld [vmem:[%s1444_s1 + $0x90] sm:$0xff]  }
   0x5   :  { %939 = vmatpush3.bf16.msra.mxu1 %v1054_v3  ;;  %v1063_v12 = vld [vmem:[%s1444_s1 + $0x58] sm:$0xff]   ;;  %v1067_v16 = vld [vmem:[%s1444_s1 + $0x60] sm:$0xff]   ;;  %v1071_v20 = vld [vmem:[%s1444_s1 + $0x68] sm:$0xff]  }
   0x6   :  { %940 = vmatprep.subr.bf16.mxu1 %v1057_v6  ;;  %v1064_v13 = vld [vmem:[%s1444_s1 + $0x18] sm:$0xff]   ;;  %v1068_v17 = vld [vmem:[%s1444_s1 + $0x20] sm:$0xff]   ;;  %v1072_v21 = vld [vmem:[%s1444_s1 + $0x28] sm:$0xff]  }
   0x7   :  { %919 = vmatpush3.bf16.msra.mxu0 %v1056_v5  ;;  %v1065_v14 = vld [vmem:[%s1444_s1 + $0xd8] sm:$0xff]   ;;  %v1069_v18 = vld [vmem:[%s1444_s1 + $0xe0] sm:$0xff]   ;;  %v1073_v22 = vld [vmem:[%s1444_s1 + $0xe8] sm:$0xff]  }
   0x8   :  { %920 = vmatprep.subr.bf16.mxu0 %v1059_v8  ;;  %v1066_v15 = vld [vmem:[%s1444_s1 + $0x98] sm:$0xff]   ;;  %v1070_v19 = vld [vmem:[%s1444_s1 + $0xa0] sm:$0xff]   ;;  %v1074_v23 = vld [vmem:[%s1444_s1 + $0xa8] sm:$0xff]  }
   0x9   :  { %941 = vmatpush3.bf16.msra.mxu1 %v1058_v7  ;;  %v1075_v24 = vld [vmem:[%s1444_s1 + $0x70] sm:$0xff]   ;;  %v1079_v28 = vld [vmem:[%s1444_s1 + $0x78] sm:$0xff]   ;;  %v29_v31 = vld [vmem:[%s1443_s0 + $0x8] sm:$0xff] }
   0xa   :  { %942 = vmatprep.subr.bf16.mxu1 %v1061_v10  ;;  %v1076_v25 = vld [vmem:[%s1444_s1 + $0x30] sm:$0xff]   ;;  %v1080_v29 = vld [vmem:[%s1444_s1 + $0x38] sm:$0xff]   ;;  %v36_v32 = vpack.c.bf16 %v29_v31, %v29_v31  ;;  %v28_v34 = vld [vmem:[%s1443_s0] sm:$0xff] }
   0xb   :  { %921 = vmatpush3.bf16.msra.mxu0 %v1060_v9  ;;  %v1077_v26 = vld [vmem:[%s1444_s1 + $0xf0] sm:$0xff]   ;;  %v1081_v30 = vld [vmem:[%s1444_s1 + $0xf8] sm:$0xff]   ;;  %v35_v35 = vpack.c.bf16 %v28_v34, %v28_v34  ;;  %v1083_v36 = vld [vmem:[%s1444_s1 + $0x140] sm:$0xff]  }
   0xc   :  { %922 = vmatprep.subr.bf16.mxu0 %v1063_v12  ;;  %v1078_v27 = vld [vmem:[%s1444_s1 + $0xb0] sm:$0xff]   ;;  %v1082_v33 = vld [vmem:[%s1444_s1 + $0xb8] sm:$0xff]   ;;  %477 = vmatprep.mubr.bf16.mxu0 %v36_v32  ;;  %v1084_v39 = vld [vmem:[%s1444_s1 + $0x100] sm:$0xff]  }
   0xd   :  { %943 = vmatpush3.bf16.msra.mxu1 %v1062_v11  ;;  %v31_v37 = vld [vmem:[%s1443_s0 + $0x18] sm:$0xff]  ;;  %v30_v40 = vld [vmem:[%s1443_s0 + $0x10] sm:$0xff]  ;;  %v1085_v42 = vld [vmem:[%s1444_s1 + $0x148] sm:$0xff]  }
   0xe   :  { %944 = vmatprep.subr.bf16.mxu1 %v1065_v14  ;;  %v38_v38 = vpack.c.bf16 %v31_v37, %v31_v37  ;;  %v37_v41 = vpack.c.bf16 %v30_v40, %v30_v40  ;;  %v1086_v43 = vld [vmem:[%s1444_s1 + $0x108] sm:$0xff]   ;;  %v1087_v45 = vld [vmem:[%s1444_s1 + $0x150] sm:$0xff]   ;;  %v1089_v47 = vld [vmem:[%s1444_s1 + $0x158] sm:$0xff]  }
   0xf   :  { %923 = vmatpush3.bf16.msra.mxu0 %v1064_v13  ;;  %v1088_v46 = vld [vmem:[%s1444_s1 + $0x110] sm:$0xff]   ;;  %v1090_v48 = vld [vmem:[%s1444_s1 + $0x118] sm:$0xff]   ;;  %v1091_v49 = vld [vmem:[%s1444_s1 + $0x160] sm:$0xff]  }
  0x10   :  { %924 = vmatprep.subr.bf16.mxu0 %v1067_v16  ;;  %517 = vmatprep.mubr.bf16.mxu1 %v38_v38  ;;  %v1092_v50 = vld [vmem:[%s1444_s1 + $0x120] sm:$0xff]   ;;  %v1093_v51 = vld [vmem:[%s1444_s1 + $0x168] sm:$0xff]   ;;  %v1095_v55 = vld [vmem:[%s1444_s1 + $0x170] sm:$0xff]  }
  0x11   :  { %945 = vmatpush3.bf16.msra.mxu1 %v1066_v15  ;;  %v1094_v52 = vld [vmem:[%s1444_s1 + $0x128] sm:$0xff]   ;;  %v1099_v53 = vld [vmem:[%s1444_s1 + $0x180] sm:$0xff]   ;;  %v34_v57 = vld [vmem:[%s1443_s0 + $0x30] sm:$0xff] }
  0x12   :  { %946 = vmatprep.subr.bf16.mxu1 %v1069_v18  ;;  %v33_v54 = vld [vmem:[%s1443_s0 + $0x28] sm:$0xff]  ;;  %v41_v58 = vpack.c.bf16 %v34_v57, %v34_v57  ;;  %v1096_v59 = vld [vmem:[%s1444_s1 + $0x130] sm:$0xff]   ;;  %v1097_v60 = vld [vmem:[%s1444_s1 + $0x178] sm:$0xff]  }
  0x13   :  { %925 = vmatpush3.bf16.msra.mxu0 %v1068_v17  ;;  %v40_v56 = vpack.c.bf16 %v33_v54, %v33_v54  ;;  %v1098_v61 = vld [vmem:[%s1444_s1 + $0x138] sm:$0xff]   ;;  %v32_v62 = vld [vmem:[%s1443_s0 + $0x20] sm:$0xff] }
  0x14   :  { %926 = vmatprep.subr.bf16.mxu0 %v1071_v20 }
  0x15   :  { %947 = vmatpush3.bf16.msra.mxu1 %v1070_v19 }
  0x16   :  { %948 = vmatprep.subr.bf16.mxu1 %v1073_v22 }
  0x17   :  { %927 = vmatpush3.bf16.msra.mxu0 %v1072_v21 }
  0x18   :  { %928 = vmatprep.subr.bf16.mxu0 %v1075_v24 }
  0x19   :  { %949 = vmatpush3.bf16.msra.mxu1 %v1074_v23 }
  0x1a   :  { %950 = vmatprep.subr.bf16.mxu1 %v1077_v26 }
  0x1b   :  { %929 = vmatpush3.bf16.msra.mxu0 %v1076_v25 }
  0x1c   :  { %930 = vmatprep.subr.bf16.mxu0 %v1079_v28 }
  0x1d   :  { %951 = vmatpush3.bf16.msra.mxu1 %v1078_v27 }
  0x1e   :  { %952 = vmatprep.subr.bf16.mxu1 %v1081_v30 }
  0x1f   :  { %931 = vmatpush3.bf16.msra.mxu0 %v1080_v29 }
  0x20   :  { %960 = vmatprep.subr.bf16.mxu0 %v1083_v36 }
  0x21   :  { %953 = vmatpush3.bf16.msra.mxu1 %v1082_v33 }
  0x22   :  { %478 = vmatmul.mubr.bf16.vlgmr.msra.gmra.mrb[0].mxu0 %v35_v35  ;;  %1002 = vmatprep.subr.bf16.mxu1 %v1140_v44 }
  0x23   :  { %961 = vmatpush3.bf16.msra.mxu0 %v1084_v39  ;;  %557 = vmatprep.mubr.bf16.mxu0 %v40_v56 }
  0x24   :  { %518 = vmatmul.mubr.bf16.vlgmr.msra.gmra.mrb[0].mxu1 %v37_v41  ;;  %962 = vmatprep.subr.bf16.mxu0 %v1085_v42 }
  0x25   :  { %1004 = vmatprep.mubr.msk.bf16.mxu1 %vm1141_vm0, %v1140_v44  ;;  %1003 = vmatpush3.bf16.msra.mxu1 %v1099_v53 }
  0x26   :  { %1008 = vmatprep.subr.bf16.mxu1 %v1140_v44 }
  0x27   :  { %963 = vmatpush3.bf16.msra.mxu0 %v1086_v43 }
  0x28   :  { %964 = vmatprep.subr.bf16.mxu0 %v1087_v45 }
  0x2b   :  { %965 = vmatpush3.bf16.msra.mxu0 %v1088_v46 }
  0x2c   :  { %966 = vmatprep.subr.bf16.mxu0 %v1089_v47  ;;  %1005 = vmatmul.mubr.msk.bf16.vlgmr.msra.gmra.mrb[4].mxu1 %vm441_vm1, %v41_v58 }
  0x2d   :  { %1024 = vmatprep.mubr.msk.bf16.mxu1 %vm1141_vm0, %v1140_v44 }
  0x2f   :  { %967 = vmatpush3.bf16.msra.mxu0 %v1090_v48 }
  0x30   :  { %968 = vmatprep.subr.bf16.mxu0 %v1091_v49 }
  0x33   :  { %969 = vmatpush3.bf16.msra.mxu0 %v1092_v50 }
  0x34   :  { %970 = vmatprep.subr.bf16.mxu0 %v1093_v51 }
  0x37   :  { %971 = vmatpush3.bf16.msra.mxu0 %v1094_v52 }
  0x38   :  { %972 = vmatprep.subr.bf16.mxu0 %v1095_v55 }
  0x3b   :  { %973 = vmatpush3.bf16.msra.mxu0 %v1096_v59 }
  0x3c   :  { %974 = vmatprep.subr.bf16.mxu0 %v1097_v60 }
  0x3d   :  { %12 = vsyncpa [#allocation3], 0  ;;  %v39_v63 = vpack.c.bf16 %v32_v62, %v32_v62  ;;  %v1100_v0 = vld [vmem:[%s1446_s3] sm:$0xff]   ;;  %v1101_v1 = vld [vmem:[%s1446_s3 + $0x8] sm:$0xff]   ;;  %s1142_s30 = smov [#allocation2]   ;;  %vm831_vm2 = vcmask 80896  }
  0x3e   :  { %1009 = vmatpush3.bf16.msra.mxu1 %v1100_v0  ;;  %v1102_v2 = vld [vmem:[%s1446_s3 + $0x10] sm:$0xff]   ;;  %v1103_v3 = vld [vmem:[%s1446_s3 + $0x18] sm:$0xff]   ;;  %v1104_v4 = vld [vmem:[%s1446_s3 + $0x20] sm:$0xff]   ;;  %s839_s8 = sshll.u32 %s1142_s30, 4  ;;  %s840_s8 = int_to_ptr.vmem [resolvable:$true] %s839_s8 }
  0x3f   :  { %975 = vmatpush3.bf16.msra.mxu0 %v1098_v61  ;;  %1010 = vmatprep.subr.bf16.mxu1 %v1140_v44  ;;  %v1105_v5 = vld [vmem:[%s1446_s3 + $0x28] sm:$0xff]   ;;  %v1106_v6 = vld [vmem:[%s1446_s3 + $0x30] sm:$0xff]   ;;  %v1107_v7 = vld [vmem:[%s1446_s3 + $0x38] sm:$0xff]   ;;  %p1121_p1 = scmp.lt.s32.totalorder %s840_s8, %s840_s8 }
  0x40   :  { %1028 = vmatprep.subr.bf16.mxu0 %v1140_v44  ;;  %v1108_v8 = vld [vmem:[%s1448_s5] sm:$0xff]   ;;  %v1109_v9 = vld [vmem:[%s1448_s5 + $0x8] sm:$0xff]   ;;  %v1110_v10 = vld [vmem:[%s1448_s5 + $0x10] sm:$0xff]  }
  0x41   :  { %v1111_v11 = vld [vmem:[%s1448_s5 + $0x18] sm:$0xff]   ;;  %v1112_v12 = vld [vmem:[%s1448_s5 + $0x20] sm:$0xff]   ;;  %v1113_v13 = vld [vmem:[%s1448_s5 + $0x28] sm:$0xff]  }
  0x42   :  { %558 = vmatmul.mubr.bf16.vlgmr.msra.gmra.mrb[4].mxu0 %v39_v63  ;;  %1011 = vmatpush3.bf16.msra.mxu1 %v1101_v1  ;;  %v847_v15 = vld [vmem:[%s1445_s2] ss:$0 sm:$0xff]  ;;  %v1114_v40 = vld [vmem:[%s1448_s5 + $0x30] sm:$0xff]   ;;  %v1115_v41 = vld [vmem:[%s1448_s5 + $0x38] sm:$0xff]  }
  0x43   :  { %1044 = vmatprep.mubr.msk.bf16.mxu0 %vm1141_vm0, %v1140_v44  ;;  %1012 = vmatprep.subr.bf16.mxu1 %v1140_v44  ;;  %v898_v42 = vld [vmem:[%s1447_s4] ss:$0 sm:$0xff]  ;;  %s1116_s4 = scalar_lea.vmem %s840_s8, 128 }
  0x44   :  { %1029 = vmatpush3.bf16.msra.mxu0 %v1108_v8  ;;  %p1117_p0 = scmp.ne.s32.totalorder %s840_s8, %s1116_s4  ;;  %p1122_p2 = scmp.lt.s32.totalorder %s1116_s4, %s1116_s4 }
  0x45   :  { %1030 = vmatprep.subr.bf16.mxu0 %v1140_v44 }
  0x46   :  { %1013 = vmatpush3.bf16.msra.mxu1 %v1102_v2  ;;  %p1123_p3 = por %p1122_p2, %p1121_p1 }
  0x47   :  { %1014 = vmatprep.subr.bf16.mxu1 %v1140_v44 }
  0x48   :  { %1031 = vmatpush3.bf16.msra.mxu0 %v1109_v9  ;;  %p1124_p4 = pnand %p1123_p3, %p1117_p0 }
  0x49   :  { %1032 = vmatprep.subr.bf16.mxu0 %v1140_v44 }
  0x4a   :  { %1015 = vmatpush3.bf16.msra.mxu1 %v1103_v3 }
  0x4b   :  { %1016 = vmatprep.subr.bf16.mxu1 %v1140_v44 }
  0x4c   :  { %1033 = vmatpush3.bf16.msra.mxu0 %v1110_v10 }
  0x4d   :  { %1034 = vmatprep.subr.bf16.mxu0 %v1140_v44 }
  0x4e   :  { %1017 = vmatpush3.bf16.msra.mxu1 %v1104_v4 }
  0x4f   :  { %1018 = vmatprep.subr.bf16.mxu1 %v1140_v44 }
  0x50   :  { %1035 = vmatpush3.bf16.msra.mxu0 %v1111_v11 }
  0x51   :  { %1036 = vmatprep.subr.bf16.mxu0 %v1140_v44 }
  0x52   :  { %1019 = vmatpush3.bf16.msra.mxu1 %v1105_v5 }
  0x53   :  { %1020 = vmatprep.subr.bf16.mxu1 %v1140_v44 }
  0x54   :  { %1037 = vmatpush3.bf16.msra.mxu0 %v1112_v12 }
  0x55   :  { %1038 = vmatprep.subr.bf16.mxu0 %v1140_v44 }
  0x56   :  { %1021 = vmatpush3.bf16.msra.mxu1 %v1106_v6 }
  0x57   :  { %1022 = vmatprep.subr.bf16.mxu1 %v1140_v44 }
  0x58   :  { %1039 = vmatpush3.bf16.msra.mxu0 %v1113_v13 }
  0x59   :  { %1040 = vmatprep.subr.bf16.mxu0 %v1140_v44 }
  0x5a   :  { %1023 = vmatpush3.bf16.msra.mxu1 %v1107_v7 }
  0x5c   :  { %1041 = vmatpush3.bf16.msra.mxu0 %v1114_v40 }
  0x5d   :  { %1042 = vmatprep.subr.bf16.mxu0 %v1140_v44  ;;  %v907_v44 = vld [vmem:[%s1449_s6] ss:$0 sm:$0xff] }
  0x60   :  { %1043 = vmatpush3.bf16.msra.mxu0 %v1115_v41 }
  0xf5   :  { %v932_v14 = vpop.f32.mrb[0].mxu0 }
  0xf6   :  { %v933_v16 = vpop.f32.mrb[1].mxu0 }
  0xf7   :  { %v934_v17 = vadd.f32 %v933_v16, %v932_v14  ;;  %v935_v18 = vpop.f32.mrb[2].mxu0  ;;  %v954_v19 = vpop.f32.mrb[0].mxu1 }
  0xf8   :  { %v936_v20 = vpop.f32.mrb[3].mxu0  ;;  %v955_v22 = vpop.f32.mrb[1].mxu1 }
  0xf9   :  { %v480_v21 = vadd.f32 %v934_v17, %v847_v15  ;;  %v956_v23 = vadd.f32 %v955_v22, %v954_v19  ;;  %v957_v24 = vpop.f32.mrb[2].mxu1 }
  0xfa   :  { %v958_v25 = vpop.f32.mrb[3].mxu1 }
  0xfb   :  { %v520_v26 = vadd.f32 %v956_v23, %v480_v21 }
  0xff   :  { %v599_v27 = vpop.f32.mrb[4].mxu1 }
 0x100   :  { %v1006_v28 = vpop.f32.mrb[5].mxu1 }
 0x101   :  { %v602_v29 = vpop.f32.mrb[6].mxu1 }
 0x102   :  { %v1007_v30 = vpop.f32.mrb[7].mxu1 }
 0x115   :  { %v976_v31 = vpop.f32.mrb[4].mxu0 }
 0x116   :  { %v977_v32 = vpop.f32.mrb[5].mxu0 }
 0x117   :  { %v978_v33 = vadd.f32 %v977_v32, %v976_v31  ;;  %v979_v34 = vpop.f32.mrb[6].mxu0 }
 0x118   :  { %v980_v35 = vpop.f32.mrb[7].mxu0 }
 0x119   :  { %v560_v36 = vadd.f32 %v978_v33, %v520_v26 }
 0x11b   :  { %v600_v37 = vadd.f32 %v599_v27, %v560_v36 }
 0x11d   :  { %v605_v38 = vmax.f32 %v600_v37, 0.0 }
 0x11f   :  { %v606_v39 = vpack.c.bf16 %v605_v38, %v605_v38 }
 0x121   :  { %1025 = vmatmul.mubr.bf16.vlgmr.msra.gmra.mrb[8].mxu1 %v606_v39 }
 0x1f4   :  { %v712_v43 = vpop.f32.mrb[8].mxu1 }
 0x1f5   :  { %v713_v45 = vadd.f32 %v898_v42, %v712_v43  ;;  %v1026_v46 = vpop.f32.mrb[9].mxu1 }
 0x1f6   :  { %v715_v47 = vpop.f32.mrb[10].mxu1 }
 0x1f7   :  { %v718_v48 = vmax.f32 %v713_v45, 0.0  ;;  %v1027_v49 = vpop.f32.mrb[11].mxu1 }
 0x1f9   :  { %v719_v50 = vpack.c.bf16 %v718_v48, %v718_v48 }
 0x1fb   :  { %1045 = vmatmul.mubr.bf16.vlgmr.msra.gmra.mrb[8].mxu0 %v719_v50 }
 0x2ce   :  { %v825_v51 = vpop.f32.mrb[8].mxu0 }
 0x2cf   :  { %v826_v52 = vadd.f32 %v907_v44, %v825_v51  ;;  %v1046_v53 = vpop.f32.mrb[9].mxu0 }
 0x2d0   :  { %v828_v54 = vpop.f32.mrb[10].mxu0 }
 0x2d1   :  { %v1047_v55 = vpop.f32.mrb[11].mxu0  ;;  %832 = vst.msk [vmem:[#allocation2] sm:$0xff] %vm831_vm2, %v826_v52 }
 0x2d2   :  { %1127 = shalt.err (!%p1124_p4)
}
 0x2d3   :  { %s1128_s6 = scalar_lea.hbm %s1450_s7, 128 }
 0x2d4   :  { %p1129_p5 = scmp.ne.s32.totalorder %s1450_s7, %s1128_s6  ;;  %p1132_p6 = scmp.lt.u32.totalorder %s1128_s6, %s1450_s7 }
 0x2d6   :  { %p1134_p7 = pnand %p1132_p6, %p1129_p5 }
 0x2d8   :  { %1137 = shalt.err (!%p1134_p7)
}
 0x2d9   :  { %842 = dma.vmem_to_hbm [thread:$0]  %s840_s8, 128, %s1450_s7, [#allocation3]  }
 0x2da   :  { %1138 = dma.done.wait [#allocation3], 128  }
 0x2db   :  { %1139 = vsyncadd [#allocation3], 4294967168 }
 0x2dc   :  { %846 = vsyncpa [#allocation3], 1 }

</bundles_post_ra>
